<compile_context>
chip_gen: v7x
topology: tpu7x:2x2x1
jax: 0.10.0
libtpu: 0.0.40
codegen_flags: <defaults>
</compile_context>

<pallas_src>
import functools
import math

import jax
import jax.numpy as jnp
from jax import lax
from jax.experimental import pallas as pl
from jax.experimental.pallas import tpu as pltpu


# ------------------------------------------------------- fused QKV kernel ---
def _qkv_kernel(x_ref, w_ref, b_ref, q_ref, k_ref, v_ref, *, d_model):
    # One wide matmul (N = 3*D) instead of three separate projections.
    y = jnp.dot(x_ref[...], w_ref[...], preferred_element_type=jnp.float32)
    y = y + b_ref[...]
    q_ref[...] = y[:, :d_model].astype(q_ref.dtype)
    k_ref[...] = y[:, d_model:2 * d_model].astype(k_ref.dtype)
    v_ref[...] = y[:, 2 * d_model:].astype(v_ref.dtype)


def _row_tile(n_rows, target=512):
    """Largest sublane-aligned divisor of n_rows that is <= target."""
    if n_rows <= target:
        return n_rows                      # full-array block is always legal
    for t in range(target - target % 8, 7, -8):
        if n_rows % t == 0:
            return t
    return n_rows


def fused_qkv(x2d, wqkv, bqkv, d_model):
    """x2d: (B*S, Din) -> (q, k, v), each (B*S, D)."""
    BS, Din = x2d.shape
    # Big row tiles amortise the ~0.35us per-grid-step overhead; for the toy
    # shapes this is a single grid step.
    TR = _row_tile(BS)
    out = jax.ShapeDtypeStruct((BS, d_model), jnp.float32)
    return pl.pallas_call(
        functools.partial(_qkv_kernel, d_model=d_model),
        out_shape=(out, out, out),
        grid=(BS // TR,),
        in_specs=[
            pl.BlockSpec((TR, Din), lambda i: (i, 0)),
            pl.BlockSpec((Din, 3 * d_model), lambda i: (0, 0)),
            pl.BlockSpec((1, 3 * d_model), lambda i: (0, 0)),
        ],
        out_specs=(
            pl.BlockSpec((TR, d_model), lambda i: (i, 0)),
            pl.BlockSpec((TR, d_model), lambda i: (i, 0)),
            pl.BlockSpec((TR, d_model), lambda i: (i, 0)),
        ),
        compiler_params=pltpu.CompilerParams(dimension_semantics=("parallel",)),
    )(x2d, wqkv, bqkv)


# ------------------- fused attention + dense + LN + FFN + LN (per batch) ----
def _attn_tail_kernel(q_ref, k_ref, v_ref, mb_ref, x_ref,
                      wd_ref, bd_ref, g_ref, be_ref,
                      w1_ref, b1_ref, w2_ref, b2_ref, o_ref):
    q = q_ref[0]          # (H, S, dk) -- 1/sqrt(d_k) already folded into wq/bq
    k = k_ref[0]
    v = v_ref[0]

    # ---- attention: all H heads of this batch element in one batched pass --
    s = jnp.einsum('hqd,hkd->hqk', q, k, preferred_element_type=jnp.float32)
    s = s + mb_ref[0]                       # mask pre-scaled by -1e9 on host
    s = s - jnp.max(s, axis=-1, keepdims=True)
    e = jnp.exp(s)
    # Exact reciprocal: pl.reciprocal(..., approx=True) would use the idle EUP
    # slot, but its approximation error risks the 1e-4 check vs the reference.
    p = e / jnp.sum(e, axis=-1, keepdims=True)
    r = jnp.einsum('hqk,hkd->hqd', p, v, preferred_element_type=jnp.float32)

    # ---- head combine fused with the output projection ---------------------
    # combined[:, h*dk + d] = r[h, :, d]  and  dense = combined @ wdense
    #   == sum_h r[h] @ wdense[h*dk:(h+1)*dk, :]
    # wdense is passed pre-reshaped to (H, dk, D) so no in-kernel transpose or
    # lane-dim reshape is needed.
    partial = jnp.einsum('hsd,hde->hse', r, wd_ref[...],
                         preferred_element_type=jnp.float32)
    dense = jnp.sum(partial, axis=0) + bd_ref[...]          # (S, D)

    x = x_ref[0]                                            # (S, D)
    gamma = g_ref[...]                                      # hoist: read once
    beta = be_ref[...]

    def layer_norm(t):      # PyTorch LayerNorm: biased variance, eps=1e-5
        mu = jnp.mean(t, axis=-1, keepdims=True)
        d = t - mu
        var = jnp.mean(d * d, axis=-1, keepdims=True)
        return d * lax.rsqrt(var + 1e-5) * gamma + beta

    x1 = layer_norm(dense + x)                              # dropout == identity
    h = jnp.dot(x1, w1_ref[...], preferred_element_type=jnp.float32) + b1_ref[...]
    h = jnp.maximum(h, 0.0)
    f = jnp.dot(h, w2_ref[...], preferred_element_type=jnp.float32) + b2_ref[...]
    o_ref[0] = layer_norm(f + x1).astype(o_ref.dtype)       # dropout == identity


def attn_tail(q, k, v, mask_bias, x, wd3, bd, gamma, beta, w1, b1, w2, b2):
    B, H, S, dk = q.shape
    D = H * dk
    dff = w1.shape[1]
    qkv_spec = pl.BlockSpec((1, H, S, dk), lambda b: (b, 0, 0, 0))
    const2 = lambda shape: pl.BlockSpec(shape, lambda b: (0, 0))
    return pl.pallas_call(
        _attn_tail_kernel,
        out_shape=jax.ShapeDtypeStruct((B, S, D), jnp.float32),
        grid=(B,),
        in_specs=[
            qkv_spec, qkv_spec, qkv_spec,
            pl.BlockSpec((1, S, S), lambda b: (b, 0, 0)),
            pl.BlockSpec((1, S, D), lambda b: (b, 0, 0)),
            pl.BlockSpec((H, dk, D), lambda b: (0, 0, 0)),
            const2((1, D)), const2((1, D)), const2((1, D)),
            const2((D, dff)), const2((1, dff)),
            const2((dff, D)), const2((1, D)),
        ],
        out_specs=pl.BlockSpec((1, S, D), lambda b: (b, 0, 0)),
        compiler_params=pltpu.CompilerParams(dimension_semantics=("parallel",)),
    )(q, k, v, mask_bias, x, wd3, bd, gamma, beta, w1, b1, w2, b2)


# ------------------------------------------------------------- full layer ---
def transformer_layer(x, mask, params, num_heads):
    B, S, Din = x.shape
    D = params["wq"].shape[1]
    d_k = D // num_heads
    scale = 1.0 / math.sqrt(d_k)

    # One-time host-side weight prep (cheap XLA ops, fused away under jit):
    #  * fold 1/sqrt(d_k) into wq/bq,
    #  * concatenate the three projections into a single (Din, 3D) weight,
    #  * reshape wdense to (H, d_k, D) for the fused head-combine projection,
    #  * pre-multiply the {0,1} mask by -1e9 (additive bias).
    wqkv = jnp.concatenate(
        [params["wq"] * scale, params["wk"], params["wv"]], axis=1)
    bqkv = jnp.concatenate(
        [params["bq"] * scale, params["bk"], params["bv"]], axis=1)
    wd3 = params["wdense"].reshape(num_heads, d_k, D)
    mask_bias = mask * jnp.float32(-1e9)

    q, k, v = fused_qkv(x.reshape(B * S, Din), wqkv, bqkv, D)
    # __split_heads: raw .view (B, S, D) -> (B, H, S, d_k) (no transpose!).
    # Contiguous reshape -> pure metadata in XLA, no HBM copy.
    q = q.reshape(B, num_heads, S, d_k)
    k = k.reshape(B, num_heads, S, d_k)
    v = v.reshape(B, num_heads, S, d_k)

    return attn_tail(q, k, v, mask_bias, x, wd3, params["bdense"],
                     params["ln_gamma"], params["ln_beta"],
                     params["w1"], params["b1"], params["w2"], params["b2"])


# ------------------------------------------------------ pure-JAX reference --
def transformer_layer_ref(x, mask, params, num_heads):
    B, S, _ = x.shape
    D = params["wq"].shape[1]
    d_k = D // num_heads
    lin = lambda t, w, b: t @ w + b[0]
    q = lin(x, params["wq"], params["bq"]).reshape(B, num_heads, S, d_k)
    k = lin(x, params["wk"], params["bk"]).reshape(B, num_heads, S, d_k)
    v = lin(x, params["wv"], params["bv"]).reshape(B, num_heads, S, d_k)
    s = jnp.einsum("bhqd,bhkd->bhqk", q, k) / math.sqrt(d_k)
    s = s + mask[:, None, :, :] * (-1e9)
    p = jax.nn.softmax(s, axis=-1)
    r = jnp.einsum("bhqk,bhkd->bhqd", p, v)
    r = jnp.transpose(r, (0, 2, 1, 3)).reshape(B, S, D)
    r = lin(r, params["wdense"], params["bdense"])

    def ln(t):
        mu = jnp.mean(t, axis=-1, keepdims=True)
        var = jnp.mean((t - mu) ** 2, axis=-1, keepdims=True)
        return (t - mu) / jnp.sqrt(var + 1e-5) * params["ln_gamma"][0] + params["ln_beta"][0]

    x1 = ln(r + x)
    h = jnp.maximum(lin(x1, params["w1"], params["b1"]), 0.0)
    f = lin(h, params["w2"], params["b2"])
    return ln(f + x1)


# -------------------------------------------------------------------- main --
def init_params(key, input_dim, d_model, dff):
    ks = jax.random.split(key, 12)

    def lin_init(kw, kb, fan_in, fan_out):
        bound = 1.0 / math.sqrt(fan_in)
        w = jax.random.uniform(kw, (fan_in, fan_out), jnp.float32, -bound, bound)
        b = jax.random.uniform(kb, (1, fan_out), jnp.float32, -bound, bound)
        return w, b

    wq, bq = lin_init(ks[0], ks[1], input_dim, d_model)
    wk, bk = lin_init(ks[2], ks[3], input_dim, d_model)
    wv, bv = lin_init(ks[4], ks[5], input_dim, d_model)
    wdense, bdense = lin_init(ks[6], ks[7], d_model, d_model)
    w1, b1 = lin_init(ks[8], ks[9], d_model, dff)
    w2, b2 = lin_init(ks[10], ks[11], dff, d_model)
    return dict(wq=wq, bq=bq, wk=wk, bk=bk, wv=wv, bv=bv,
                wdense=wdense, bdense=bdense,
                ln_gamma=jnp.ones((1, d_model), jnp.float32),
                ln_beta=jnp.zeros((1, d_model), jnp.float32),
                w1=w1, b1=b1, w2=w2, b2=b2)


if __name__ == "__main__":
    B, S = 2, 8
    input_dim = d_model = 32          # residual x1 + x requires input_dim == d_model
    dff, num_heads = 64, 4

    key = jax.random.PRNGKey(0)
    kx, km, kp = jax.random.split(key, 3)
    x = jax.random.normal(kx, (B, S, input_dim), jnp.float32)
    # padding-style mask (B, S, S): 1.0 = masked position, 0.0 = attend
    mask = (jax.random.uniform(km, (B, 1, S)) < 0.25).astype(jnp.float32)
    mask = jnp.broadcast_to(mask, (B, S, S))
    params = init_params(kp, input_dim, d_model, dff)

    layer = jax.jit(functools.partial(transformer_layer, num_heads=num_heads))
    out = layer(x, mask, params)
    out = jax.block_until_ready(out)

    ref = transformer_layer_ref(x, mask, params, num_heads)
    assert out.shape == (B, S, d_model)
    assert jnp.allclose(out, ref, atol=1e-4, rtol=1e-4), "mismatch vs reference"

    print("KERNEL_OK")
</pallas_src>

<mosaic_0001>
module attributes {stable_mosaic.version = 11 : i64} {
  func.func @_qkv_kernel(%arg0: i32, %arg1: memref<16x32xf32, #tpu.memory_space<vmem>>, %arg2: memref<32x96xf32, #tpu.memory_space<vmem>>, %arg3: memref<1x96xf32, #tpu.memory_space<vmem>>, %arg4: memref<16x32xf32, #tpu.memory_space<vmem>>, %arg5: memref<16x32xf32, #tpu.memory_space<vmem>>, %arg6: memref<16x32xf32, #tpu.memory_space<vmem>>) attributes {dimension_semantics = [#tpu.dimension_semantics<parallel>], iteration_bounds = array<i64: 1>, scalar_prefetch = 0 : i64, scratch_operands = 0 : i64, tpu.core_type = #tpu.core_type<tc>, window_params = [{transform_indices = @transform_0, window_bounds = array<i64: 16, 32>}, {pipeline_mode = #tpu.pipeline_mode<synchronous>, transform_indices = @transform_1, window_bounds = array<i64: 32, 96>}, {pipeline_mode = #tpu.pipeline_mode<synchronous>, transform_indices = @transform_2, window_bounds = array<i64: 1, 96>}, {transform_indices = @transform_3, window_bounds = array<i64: 16, 32>}, {transform_indices = @transform_4, window_bounds = array<i64: 16, 32>}, {transform_indices = @transform_5, window_bounds = array<i64: 16, 32>}]} {
    %c0 = arith.constant 0 : index
    %c0_0 = arith.constant 0 : index
    %0 = vector.load %arg1[%c0, %c0_0] : memref<16x32xf32, #tpu.memory_space<vmem>>, vector<16x32xf32>
    %c0_1 = arith.constant 0 : index
    %c0_2 = arith.constant 0 : index
    %1 = vector.load %arg2[%c0_1, %c0_2] : memref<32x96xf32, #tpu.memory_space<vmem>>, vector<32x96xf32>
    %cst = arith.constant dense<0.000000e+00> : vector<16x96xf32>
    %2 = tpu.matmul %0, %1, %cst {dimension_numbers = #tpu.dot_dimension_numbers<[1], [0], [0], [1], [0, 0, 1, 1], [], []>} : vector<16x32xf32>, vector<32x96xf32>, vector<16x96xf32> -> vector<16x96xf32>
    %c0_3 = arith.constant 0 : index
    %c0_4 = arith.constant 0 : index
    %3 = vector.load %arg3[%c0_3, %c0_4] : memref<1x96xf32, #tpu.memory_space<vmem>>, vector<1x96xf32>
    %4 = vector.broadcast %3 : vector<1x96xf32> to vector<16x96xf32>
    %5 = arith.addf %2, %4 : vector<16x96xf32>
    %6 = vector.extract_strided_slice %5 {offsets = [0, 0], sizes = [16, 32], strides = [1, 1]} : vector<16x96xf32> to vector<16x32xf32>
    %c0_5 = arith.constant 0 : index
    %c0_6 = arith.constant 0 : index
    %7 = vector.load %arg4[%c0_5, %c0_6] : memref<16x32xf32, #tpu.memory_space<vmem>>, vector<16x32xf32>
    tpu.vector_store %arg4[%c0_5, %c0_6], %6 {strides = array<i32>} : memref<16x32xf32, #tpu.memory_space<vmem>>, vector<16x32xf32>,
    %8 = vector.extract_strided_slice %5 {offsets = [0, 32], sizes = [16, 32], strides = [1, 1]} : vector<16x96xf32> to vector<16x32xf32>
    %c0_7 = arith.constant 0 : index
    %c0_8 = arith.constant 0 : index
    %9 = vector.load %arg5[%c0_7, %c0_8] : memref<16x32xf32, #tpu.memory_space<vmem>>, vector<16x32xf32>
    tpu.vector_store %arg5[%c0_7, %c0_8], %8 {strides = array<i32>} : memref<16x32xf32, #tpu.memory_space<vmem>>, vector<16x32xf32>,
    %10 = vector.extract_strided_slice %5 {offsets = [0, 64], sizes = [16, 32], strides = [1, 1]} : vector<16x96xf32> to vector<16x32xf32>
    %c0_9 = arith.constant 0 : index
    %c0_10 = arith.constant 0 : index
    %11 = vector.load %arg6[%c0_9, %c0_10] : memref<16x32xf32, #tpu.memory_space<vmem>>, vector<16x32xf32>
    tpu.vector_store %arg6[%c0_9, %c0_10], %10 {strides = array<i32>} : memref<16x32xf32, #tpu.memory_space<vmem>>, vector<16x32xf32>,
    return
  }
  func.func @transform_0(%arg0: i32) -> (i32, i32) {
    %c0_i32 = arith.constant 0 : i32
    %c0_i32_0 = arith.constant 0 : i32
    return %arg0, %c0_i32 : i32, i32
  }
  func.func @transform_1(%arg0: i32) -> (i32, i32) {
    %c0_i32 = arith.constant 0 : i32
    %c0_i32_0 = arith.constant 0 : i32
    %c0_i32_1 = arith.constant 0 : i32
    return %c0_i32, %c0_i32_0 : i32, i32
  }
  func.func @transform_2(%arg0: i32) -> (i32, i32) {
    %c0_i32 = arith.constant 0 : i32
    %c0_i32_0 = arith.constant 0 : i32
    %c0_i32_1 = arith.constant 0 : i32
    return %c0_i32, %c0_i32_0 : i32, i32
  }
  func.func @transform_3(%arg0: i32) -> (i32, i32) {
    %c0_i32 = arith.constant 0 : i32
    %c0_i32_0 = arith.constant 0 : i32
    return %arg0, %c0_i32 : i32, i32
  }
  func.func @transform_4(%arg0: i32) -> (i32, i32) {
    %c0_i32 = arith.constant 0 : i32
    %c0_i32_0 = arith.constant 0 : i32
    return %arg0, %c0_i32 : i32, i32
  }
  func.func @transform_5(%arg0: i32) -> (i32, i32) {
    %c0_i32 = arith.constant 0 : i32
    %c0_i32_0 = arith.constant 0 : i32
    return %arg0, %c0_i32 : i32, i32
  }
}

module attributes {stable_mosaic.version = 11 : i64} {
  func.func @_attn_tail_kernel(%arg0: i32, %arg1: memref<1x4x8x8xf32, #tpu.memory_space<vmem>>, %arg2: memref<1x4x8x8xf32, #tpu.memory_space<vmem>>, %arg3: memref<1x4x8x8xf32, #tpu.memory_space<vmem>>, %arg4: memref<1x8x8xf32, #tpu.memory_space<vmem>>, %arg5: memref<1x8x32xf32, #tpu.memory_space<vmem>>, %arg6: memref<4x8x32xf32, #tpu.memory_space<vmem>>, %arg7: memref<1x32xf32, #tpu.memory_space<vmem>>, %arg8: memref<1x32xf32, #tpu.memory_space<vmem>>, %arg9: memref<1x32xf32, #tpu.memory_space<vmem>>, %arg10: memref<32x64xf32, #tpu.memory_space<vmem>>, %arg11: memref<1x64xf32, #tpu.memory_space<vmem>>, %arg12: memref<64x32xf32, #tpu.memory_space<vmem>>, %arg13: memref<1x32xf32, #tpu.memory_space<vmem>>, %arg14: memref<1x8x32xf32, #tpu.memory_space<vmem>>) attributes {dimension_semantics = [#tpu.dimension_semantics<parallel>], iteration_bounds = array<i64: 2>, scalar_prefetch = 0 : i64, scratch_operands = 0 : i64, tpu.core_type = #tpu.core_type<tc>, window_params = [{transform_indices = @transform_0, window_bounds = array<i64: 1, 4, 8, 8>}, {transform_indices = @transform_1, window_bounds = array<i64: 1, 4, 8, 8>}, {transform_indices = @transform_2, window_bounds = array<i64: 1, 4, 8, 8>}, {transform_indices = @transform_3, window_bounds = array<i64: 1, 8, 8>}, {transform_indices = @transform_4, window_bounds = array<i64: 1, 8, 32>}, {pipeline_mode = #tpu.pipeline_mode<synchronous>, transform_indices = @transform_5, window_bounds = array<i64: 4, 8, 32>}, {pipeline_mode = #tpu.pipeline_mode<synchronous>, transform_indices = @transform_6, window_bounds = array<i64: 1, 32>}, {pipeline_mode = #tpu.pipeline_mode<synchronous>, transform_indices = @transform_7, window_bounds = array<i64: 1, 32>}, {pipeline_mode = #tpu.pipeline_mode<synchronous>, transform_indices = @transform_8, window_bounds = array<i64: 1, 32>}, {pipeline_mode = #tpu.pipeline_mode<synchronous>, transform_indices = @transform_9, window_bounds = array<i64: 32, 64>}, {pipeline_mode = #tpu.pipeline_mode<synchronous>, transform_indices = @transform_10, window_bounds = array<i64: 1, 64>}, {pipeline_mode = #tpu.pipeline_mode<synchronous>, transform_indices = @transform_11, window_bounds = array<i64: 64, 32>}, {pipeline_mode = #tpu.pipeline_mode<synchronous>, transform_indices = @transform_12, window_bounds = array<i64: 1, 32>}, {transform_indices = @transform_13, window_bounds = array<i64: 1, 8, 32>}]} {
    %c0 = arith.constant 0 : index
    %c0_0 = arith.constant 0 : index
    %c0_1 = arith.constant 0 : index
    %c0_2 = arith.constant 0 : index
    %0 = vector.load %arg1[%c0, %c0_0, %c0_1, %c0_2] : memref<1x4x8x8xf32, #tpu.memory_space<vmem>>, vector<1x4x8x8xf32>
    %1 = vector.shape_cast %0 : vector<1x4x8x8xf32> to vector<4x8x8xf32>
    %c0_3 = arith.constant 0 : index
    %c0_4 = arith.constant 0 : index
    %c0_5 = arith.constant 0 : index
    %c0_6 = arith.constant 0 : index
    %2 = vector.load %arg2[%c0_3, %c0_4, %c0_5, %c0_6] : memref<1x4x8x8xf32, #tpu.memory_space<vmem>>, vector<1x4x8x8xf32>
    %3 = vector.shape_cast %2 : vector<1x4x8x8xf32> to vector<4x8x8xf32>
    %c0_7 = arith.constant 0 : index
    %c0_8 = arith.constant 0 : index
    %c0_9 = arith.constant 0 : index
    %c0_10 = arith.constant 0 : index
    %4 = vector.load %arg3[%c0_7, %c0_8, %c0_9, %c0_10] : memref<1x4x8x8xf32, #tpu.memory_space<vmem>>, vector<1x4x8x8xf32>
    %5 = vector.shape_cast %4 : vector<1x4x8x8xf32> to vector<4x8x8xf32>
    "tpu.trace_start"() <{level = 10 : i32, message = "hqd,hkd->hqk"}> : () -> ()
    %cst = arith.constant dense<0.000000e+00> : vector<4x8x8xf32>
    %6 = tpu.matmul %1, %3, %cst {dimension_numbers = #tpu.dot_dimension_numbers<[2], [2], [1], [1], [0, 0, 0, 1, 1, 1], [0], [0]>} : vector<4x8x8xf32>, vector<4x8x8xf32>, vector<4x8x8xf32> -> vector<4x8x8xf32>
    "tpu.trace_stop"() : () -> ()
    %c0_11 = arith.constant 0 : index
    %c0_12 = arith.constant 0 : index
    %c0_13 = arith.constant 0 : index
    %7 = vector.load %arg4[%c0_11, %c0_12, %c0_13] : memref<1x8x8xf32, #tpu.memory_space<vmem>>, vector<1x8x8xf32>
    %8 = vector.shape_cast %7 : vector<1x8x8xf32> to vector<8x8xf32>
    %9 = vector.shape_cast %8 : vector<8x8xf32> to vector<1x8x8xf32>
    %10 = vector.broadcast %9 : vector<1x8x8xf32> to vector<4x8x8xf32>
    %11 = arith.addf %6, %10 : vector<4x8x8xf32>
    %cst_14 = arith.constant dense<0xFF800000> : vector<4x8xf32>
    %12 = vector.multi_reduction <maximumf>, %11, %cst_14 [2] : vector<4x8x8xf32> to vector<4x8xf32>
    %13 = vector.shape_cast %12 : vector<4x8xf32> to vector<4x8x1xf32>
    %14 = vector.broadcast %13 : vector<4x8x1xf32> to vector<4x8x8xf32>
    %15 = arith.subf %11, %14 : vector<4x8x8xf32>
    %16 = math.exp %15 : vector<4x8x8xf32>
    %cst_15 = arith.constant dense<0.000000e+00> : vector<4x8xf32>
    %17 = vector.multi_reduction <add>, %16, %cst_15 [2] : vector<4x8x8xf32> to vector<4x8xf32>
    %18 = vector.shape_cast %17 : vector<4x8xf32> to vector<4x8x1xf32>
    %19 = vector.broadcast %18 : vector<4x8x1xf32> to vector<4x8x8xf32>
    %20 = arith.divf %16, %19 : vector<4x8x8xf32>
    "tpu.trace_start"() <{level = 10 : i32, message = "hqk,hkd->hqd"}> : () -> ()
    %cst_16 = arith.constant dense<0.000000e+00> : vector<4x8x8xf32>
    %21 = tpu.matmul %20, %5, %cst_16 {dimension_numbers = #tpu.dot_dimension_numbers<[2], [1], [1], [2], [0, 0, 0, 1, 1, 2], [0], [0]>} : vector<4x8x8xf32>, vector<4x8x8xf32>, vector<4x8x8xf32> -> vector<4x8x8xf32>
    "tpu.trace_stop"() : () -> ()
    %c0_17 = arith.constant 0 : index
    %c0_18 = arith.constant 0 : index
    %c0_19 = arith.constant 0 : index
    %22 = vector.load %arg6[%c0_17, %c0_18, %c0_19] : memref<4x8x32xf32, #tpu.memory_space<vmem>>, vector<4x8x32xf32>
    "tpu.trace_start"() <{level = 10 : i32, message = "hsd,hde->hse"}> : () -> ()
    %cst_20 = arith.constant dense<0.000000e+00> : vector<4x8x32xf32>
    %23 = tpu.matmul %21, %22, %cst_20 {dimension_numbers = #tpu.dot_dimension_numbers<[2], [1], [1], [2], [0, 0, 0, 1, 1, 2], [0], [0]>} : vector<4x8x8xf32>, vector<4x8x32xf32>, vector<4x8x32xf32> -> vector<4x8x32xf32>
    "tpu.trace_stop"() : () -> ()
    %cst_21 = arith.constant dense<0.000000e+00> : vector<8x32xf32>
    %24 = vector.multi_reduction <add>, %23, %cst_21 [0] : vector<4x8x32xf32> to vector<8x32xf32>
    %c0_22 = arith.constant 0 : index
    %c0_23 = arith.constant 0 : index
    %25 = vector.load %arg7[%c0_22, %c0_23] : memref<1x32xf32, #tpu.memory_space<vmem>>, vector<1x32xf32>
    %26 = vector.broadcast %25 : vector<1x32xf32> to vector<8x32xf32>
    %27 = arith.addf %24, %26 : vector<8x32xf32>
    %c0_24 = arith.constant 0 : index
    %c0_25 = arith.constant 0 : index
    %c0_26 = arith.constant 0 : index
    %28 = vector.load %arg5[%c0_24, %c0_25, %c0_26] : memref<1x8x32xf32, #tpu.memory_space<vmem>>, vector<1x8x32xf32>
    %29 = vector.shape_cast %28 : vector<1x8x32xf32> to vector<8x32xf32>
    %c0_27 = arith.constant 0 : index
    %c0_28 = arith.constant 0 : index
    %30 = vector.load %arg8[%c0_27, %c0_28] : memref<1x32xf32, #tpu.memory_space<vmem>>, vector<1x32xf32>
    %c0_29 = arith.constant 0 : index
    %c0_30 = arith.constant 0 : index
    %31 = vector.load %arg9[%c0_29, %c0_30] : memref<1x32xf32, #tpu.memory_space<vmem>>, vector<1x32xf32>
    %32 = arith.addf %27, %29 : vector<8x32xf32>
    %cst_31 = arith.constant dense<0.000000e+00> : vector<8xf32>
    %33 = vector.multi_reduction <add>, %32, %cst_31 [1] : vector<8x32xf32> to vector<8xf32>
    %34 = vector.shape_cast %33 : vector<8xf32> to vector<8x1xf32>
    %cst_32 = arith.constant 3.200000e+01 : f32
    %35 = vector.broadcast %cst_32 : f32 to vector<8x1xf32>
    %36 = arith.divf %34, %35 : vector<8x1xf32>
    %37 = vector.broadcast %36 : vector<8x1xf32> to vector<8x32xf32>
    %38 = arith.subf %32, %37 : vector<8x32xf32>
    %39 = arith.mulf %38, %38 : vector<8x32xf32>
    %cst_33 = arith.constant dense<0.000000e+00> : vector<8xf32>
    %40 = vector.multi_reduction <add>, %39, %cst_33 [1] : vector<8x32xf32> to vector<8xf32>
    %41 = vector.shape_cast %40 : vector<8xf32> to vector<8x1xf32>
    %cst_34 = arith.constant 3.200000e+01 : f32
    %42 = vector.broadcast %cst_34 : f32 to vector<8x1xf32>
    %43 = arith.divf %41, %42 : vector<8x1xf32>
    %cst_35 = arith.constant 9.99999974E-6 : f32
    %44 = vector.broadcast %cst_35 : f32 to vector<8x1xf32>
    %45 = arith.addf %43, %44 : vector<8x1xf32>
    %46 = math.rsqrt %45 : vector<8x1xf32>
    %47 = vector.broadcast %46 : vector<8x1xf32> to vector<8x32xf32>
    %48 = arith.mulf %38, %47 : vector<8x32xf32>
    %49 = vector.broadcast %30 : vector<1x32xf32> to vector<8x32xf32>
    %50 = arith.mulf %48, %49 : vector<8x32xf32>
    %51 = vector.broadcast %31 : vector<1x32xf32> to vector<8x32xf32>
    %52 = arith.addf %50, %51 : vector<8x32xf32>
    %c0_36 = arith.constant 0 : index
    %c0_37 = arith.constant 0 : index
    %53 = vector.load %arg10[%c0_36, %c0_37] : memref<32x64xf32, #tpu.memory_space<vmem>>, vector<32x64xf32>
    %cst_38 = arith.constant dense<0.000000e+00> : vector<8x64xf32>
    %54 = tpu.matmul %52, %53, %cst_38 {dimension_numbers = #tpu.dot_dimension_numbers<[1], [0], [0], [1], [0, 0, 1, 1], [], []>} : vector<8x32xf32>, vector<32x64xf32>, vector<8x64xf32> -> vector<8x64xf32>
    %c0_39 = arith.constant 0 : index
    %c0_40 = arith.constant 0 : index
    %55 = vector.load %arg11[%c0_39, %c0_40] : memref<1x64xf32, #tpu.memory_space<vmem>>, vector<1x64xf32>
    %56 = vector.broadcast %55 : vector<1x64xf32> to vector<8x64xf32>
    %57 = arith.addf %54, %56 : vector<8x64xf32>
    %cst_41 = arith.constant 0.000000e+00 : f32
    %58 = vector.broadcast %cst_41 : f32 to vector<8x64xf32>
    %59 = arith.maximumf %57, %58 : vector<8x64xf32>
    %c0_42 = arith.constant 0 : index
    %c0_43 = arith.constant 0 : index
    %60 = vector.load %arg12[%c0_42, %c0_43] : memref<64x32xf32, #tpu.memory_space<vmem>>, vector<64x32xf32>
    %cst_44 = arith.constant dense<0.000000e+00> : vector<8x32xf32>
    %61 = tpu.matmul %59, %60, %cst_44 {dimension_numbers = #tpu.dot_dimension_numbers<[1], [0], [0], [1], [0, 0, 1, 1], [], []>} : vector<8x64xf32>, vector<64x32xf32>, vector<8x32xf32> -> vector<8x32xf32>
    %c0_45 = arith.constant 0 : index
    %c0_46 = arith.constant 0 : index
    %62 = vector.load %arg13[%c0_45, %c0_46] : memref<1x32xf32, #tpu.memory_space<vmem>>, vector<1x32xf32>
    %63 = vector.broadcast %62 : vector<1x32xf32> to vector<8x32xf32>
    %64 = arith.addf %61, %63 : vector<8x32xf32>
    %65 = arith.addf %64, %52 : vector<8x32xf32>
    %cst_47 = arith.constant dense<0.000000e+00> : vector<8xf32>
    %66 = vector.multi_reduction <add>, %65, %cst_47 [1] : vector<8x32xf32> to vector<8xf32>
    %67 = vector.shape_cast %66 : vector<8xf32> to vector<8x1xf32>
    %cst_48 = arith.constant 3.200000e+01 : f32
    %68 = vector.broadcast %cst_48 : f32 to vector<8x1xf32>
    %69 = arith.divf %67, %68 : vector<8x1xf32>
    %70 = vector.broadcast %69 : vector<8x1xf32> to vector<8x32xf32>
    %71 = arith.subf %65, %70 : vector<8x32xf32>
    %72 = arith.mulf %71, %71 : vector<8x32xf32>
    %cst_49 = arith.constant dense<0.000000e+00> : vector<8xf32>
    %73 = vector.multi_reduction <add>, %72, %cst_49 [1] : vector<8x32xf32> to vector<8xf32>
    %74 = vector.shape_cast %73 : vector<8xf32> to vector<8x1xf32>
    %cst_50 = arith.constant 3.200000e+01 : f32
    %75 = vector.broadcast %cst_50 : f32 to vector<8x1xf32>
    %76 = arith.divf %74, %75 : vector<8x1xf32>
    %cst_51 = arith.constant 9.99999974E-6 : f32
    %77 = vector.broadcast %cst_51 : f32 to vector<8x1xf32>
    %78 = arith.addf %76, %77 : vector<8x1xf32>
    %79 = math.rsqrt %78 : vector<8x1xf32>
    %80 = vector.broadcast %79 : vector<8x1xf32> to vector<8x32xf32>
    %81 = arith.mulf %71, %80 : vector<8x32xf32>
    %82 = vector.broadcast %30 : vector<1x32xf32> to vector<8x32xf32>
    %83 = arith.mulf %81, %82 : vector<8x32xf32>
    %84 = vector.broadcast %31 : vector<1x32xf32> to vector<8x32xf32>
    %85 = arith.addf %83, %84 : vector<8x32xf32>
    %c0_52 = arith.constant 0 : index
    %c0_53 = arith.constant 0 : index
    %c0_54 = arith.constant 0 : index
    %86 = vector.load %arg14[%c0_52, %c0_53, %c0_54] : memref<1x8x32xf32, #tpu.memory_space<vmem>>, vector<1x8x32xf32>
    %87 = vector.shape_cast %86 : vector<1x8x32xf32> to vector<8x32xf32>
    %88 = vector.shape_cast %85 : vector<8x32xf32> to vector<1x8x32xf32>
    tpu.vector_store %arg14[%c0_52, %c0_53, %c0_54], %88 {strides = array<i32>} : memref<1x8x32xf32, #tpu.memory_space<vmem>>, vector<1x8x32xf32>,
    return
  }
  func.func @transform_0(%arg0: i32) -> (i32, i32, i32, i32) {
    %c0_i32 = arith.constant 0 : i32
    %c0_i32_0 = arith.constant 0 : i32
    %c0_i32_1 = arith.constant 0 : i32
    %c0_i32_2 = arith.constant 0 : i32
    return %arg0, %c0_i32, %c0_i32_0, %c0_i32_1 : i32, i32, i32, i32
  }
  func.func @transform_1(%arg0: i32) -> (i32, i32, i32, i32) {
    %c0_i32 = arith.constant 0 : i32
    %c0_i32_0 = arith.constant 0 : i32
    %c0_i32_1 = arith.constant 0 : i32
    %c0_i32_2 = arith.constant 0 : i32
    return %arg0, %c0_i32, %c0_i32_0, %c0_i32_1 : i32, i32, i32, i32
  }
  func.func @transform_2(%arg0: i32) -> (i32, i32, i32, i32) {
    %c0_i32 = arith.constant 0 : i32
    %c0_i32_0 = arith.constant 0 : i32
    %c0_i32_1 = arith.constant 0 : i32
    %c0_i32_2 = arith.constant 0 : i32
    return %arg0, %c0_i32, %c0_i32_0, %c0_i32_1 : i32, i32, i32, i32
  }
  func.func @transform_3(%arg0: i32) -> (i32, i32, i32) {
    %c0_i32 = arith.constant 0 : i32
    %c0_i32_0 = arith.constant 0 : i32
    %c0_i32_1 = arith.constant 0 : i32
    return %arg0, %c0_i32, %c0_i32_0 : i32, i32, i32
  }
  func.func @transform_4(%arg0: i32) -> (i32, i32, i32) {
    %c0_i32 = arith.constant 0 : i32
    %c0_i32_0 = arith.constant 0 : i32
    %c0_i32_1 = arith.constant 0 : i32
    return %arg0, %c0_i32, %c0_i32_0 : i32, i32, i32
  }
  func.func @transform_5(%arg0: i32) -> (i32, i32, i32) {
    %c0_i32 = arith.constant 0 : i32
    %c0_i32_0 = arith.constant 0 : i32
    %c0_i32_1 = arith.constant 0 : i32
    %c0_i32_2 = arith.constant 0 : i32
    return %c0_i32, %c0_i32_0, %c0_i32_1 : i32, i32, i32
  }
  func.func @transform_6(%arg0: i32) -> (i32, i32) {
    %c0_i32 = arith.constant 0 : i32
    %c0_i32_0 = arith.constant 0 : i32
    %c0_i32_1 = arith.constant 0 : i32
    return %c0_i32, %c0_i32_0 : i32, i32
  }
  func.func @transform_7(%arg0: i32) -> (i32, i32) {
    %c0_i32 = arith.constant 0 : i32
    %c0_i32_0 = arith.constant 0 : i32
    %c0_i32_1 = arith.constant 0 : i32
    return %c0_i32, %c0_i32_0 : i32, i32
  }
  func.func @transform_8(%arg0: i32) -> (i32, i32) {
    %c0_i32 = arith.constant 0 : i32
    %c0_i32_0 = arith.constant 0 : i32
    %c0_i32_1 = arith.constant 0 : i32
    return %c0_i32, %c0_i32_0 : i32, i32
  }
  func.func @transform_9(%arg0: i32) -> (i32, i32) {
    %c0_i32 = arith.constant 0 : i32
    %c0_i32_0 = arith.constant 0 : i32
    %c0_i32_1 = arith.constant 0 : i32
    return %c0_i32, %c0_i32_0 : i32, i32
  }
  func.func @transform_10(%arg0: i32) -> (i32, i32) {
    %c0_i32 = arith.constant 0 : i32
    %c0_i32_0 = arith.constant 0 : i32
    %c0_i32_1 = arith.constant 0 : i32
    return %c0_i32, %c0_i32_0 : i32, i32
  }
  func.func @transform_11(%arg0: i32) -> (i32, i32) {
    %c0_i32 = arith.constant 0 : i32
    %c0_i32_0 = arith.constant 0 : i32
    %c0_i32_1 = arith.constant 0 : i32
    return %c0_i32, %c0_i32_0 : i32, i32
  }
  func.func @transform_12(%arg0: i32) -> (i32, i32) {
    %c0_i32 = arith.constant 0 : i32
    %c0_i32_0 = arith.constant 0 : i32
    %c0_i32_1 = arith.constant 0 : i32
    return %c0_i32, %c0_i32_0 : i32, i32
  }
  func.func @transform_13(%arg0: i32) -> (i32, i32, i32) {
    %c0_i32 = arith.constant 0 : i32
    %c0_i32_0 = arith.constant 0 : i32
    %c0_i32_1 = arith.constant 0 : i32
    return %arg0, %c0_i32, %c0_i32_0 : i32, i32, i32
  }
}

</mosaic_0001>

<bundles_post_ra>
// kernel: transformer_layer.2
= control target key start
LH: loop header
LB: loop body
LE: loop exit
PB: predicated region body
PF: predicated region fallthrough
CT: control target
= control target key end

     0   :  { %vm30_vm0 = vcmask 261120   ;;  %s175_s10 = smov 96   ;;  %s253_s1 = inlined_call_operand.vmem [shape: f32[32,96], index: 1, kind: input, shape index: {}]   ;;  %s254_s0 = inlined_call_operand.vmem [shape: f32[16,32], index: 0, kind: input, shape index: {}]   ;;  %s255_s2 = inlined_call_operand.vmem [shape: f32[1,96], index: 2, kind: input, shape index: {}]   ;;  %s256_s3 = inlined_call_operand.vmem [shape: f32[16,32], index: 3, kind: output, shape index: {0}]   ;;  %s257_s5 = inlined_call_operand.vmem [shape: f32[16,32], index: 5, kind: output, shape index: {2}]   ;;  %s258_s4 = inlined_call_operand.vmem [shape: f32[16,32], index: 4, kind: output, shape index: {1}]  }
   0x1   :  { %v19_v0 = vld [vmem:[%s253_s1] sm:$0xff]  ;;  %v20_v1 = vld [vmem:[%s253_s1 + $0x8] sm:$0xff]  ;;  %v21_v2 = vld [vmem:[%s253_s1 + $0x10] sm:$0xff] }
   0x2   :  { %v164_v3 = vpack.c.bf16 %v20_v1, %v19_v0  ;;  %v22_v4 = vld [vmem:[%s253_s1 + $0x18] sm:$0xff]  ;;  %v17_v5 = vld [vmem:[%s254_s0] sm:$0xff]  ;;  %v18_v7 = vld [vmem:[%s254_s0 + $0x8] sm:$0xff]  ;;  %s174_s0 = smov 64  }
   0x3   :  { %v168_v6 = vpack.c.bf16 %v22_v4, %v21_v2  ;;  %161 = vmatprep.mubr.msk.f32.mxu0 %vm30_vm0, %v17_v5  ;;  %v144_v8 = vld [vmem:[%s255_s2] ss:$0 sm:$0xff] }
   0x4   :  { %165 = vmatprep.subr.bf16.mxu0 %v164_v3 }
   0x5   :  { %167 = vmatpush3.bf16.msra.mxu0 %v164_v3 }
   0x6   :  { %169 = vmatprep.subr.bf16.mxu0 %v168_v6 }
   0x9   :  { %171 = vmatpush3.bf16.msra.mxu0 %v168_v6 }
   0xc   :  { %162 = vmatmul.mubr.msk.f32.vlgmr.msra.gmra.mrb[0].mxu0 %vm30_vm0, %v18_v7 }
  0xdf   :  { %v163_v9 = vpop.f32.mrb[0].mxu0 }
  0xe0   :  { %v109_v10 = vadd.f32 %v163_v9, %v144_v8  ;;  %v103_v11 = vpop.f32.mrb[1].mxu0 }
  0xe1   :  { %v104_v12 = vadd.f32 %v144_v8, %v103_v11 }
  0xe2   :  { %113 = vst.msk [vmem:[%s256_s3 + $0x8] sm:$0xff] %vm30_vm0, %v109_v10 }
  0xe3   :  { %112 = vst.msk [vmem:[%s256_s3] sm:$0xff] %vm30_vm0, %v104_v12  ;;  %124 = vrot.lane.b32.xlu1 %v104_v12, %s174_s0  ;;  %116 = vrot.lane.b32.xlu0 %v104_v12, %s175_s10 }
  0xe7   :  { %126 = vrot.lane.b32.xlu1 %v109_v10, %s174_s0  ;;  %118 = vrot.lane.b32.xlu0 %v109_v10, %s175_s10 }
 0x155   :  { %v125_v13 = vpop.permute.xlu1 %124  ;;  %v117_v14 = vpop.permute.xlu0 %116 }
 0x156   :  { %130 = vst.msk [vmem:[%s257_s5] sm:$0xff] %vm30_vm0, %v125_v13  ;;  %122 = vst.msk [vmem:[%s258_s4] sm:$0xff] %vm30_vm0, %v117_v14 }
 0x159   :  { %v127_v15 = vpop.permute.xlu1 %126  ;;  %v119_v16 = vpop.permute.xlu0 %118 }
 0x15a   :  { %131 = vst.msk [vmem:[%s257_s5 + $0x8] sm:$0xff] %vm30_vm0, %v127_v15  ;;  %123 = vst.msk [vmem:[%s258_s4 + $0x8] sm:$0xff] %vm30_vm0, %v119_v16 }

// kernel: transformer_layer.3
= control target key start
LH: loop header
LB: loop body
LE: loop exit
PB: predicated region body
PF: predicated region fallthrough
CT: control target
= control target key end

     0   :  { %s2474_s0 = inlined_call_operand.vmem [shape: f32[2,4,8,8], index: 0, kind: input, shape index: {}]   ;;  %s2475_s1 = inlined_call_operand.vmem [shape: f32[2,4,8,8], index: 1, kind: input, shape index: {}]   ;;  %s2476_s2 = inlined_call_operand.vmem [shape: f32[2,4,8,8], index: 2, kind: input, shape index: {}]   ;;  %s2477_s3 = inlined_call_operand.vmem [shape: f32[2,8,8], index: 3, kind: input, shape index: {}]   ;;  %s2478_s4 = inlined_call_operand.vmem [shape: f32[2,8,32], index: 4, kind: input, shape index: {}]   ;;  %s2479_s5 = inlined_call_operand.vmem [shape: f32[4,8,32], index: 5, kind: input, shape index: {}]   ;;  %s2480_s6 = inlined_call_operand.vmem [shape: f32[1,32], index: 6, kind: input, shape index: {}]   ;;  %s2481_s7 = inlined_call_operand.vmem [shape: f32[1,32], index: 7, kind: input, shape index: {}]   ;;  %s2482_s8 = inlined_call_operand.vmem [shape: f32[1,32], index: 8, kind: input, shape index: {}]   ;;  %s2483_s9 = inlined_call_operand.vmem [shape: f32[32,64], index: 9, kind: input, shape index: {}]   ;;  %s2484_s10 = inlined_call_operand.vmem [shape: f32[1,64], index: 10, kind: input, shape index: {}]   ;;  %s2485_s11 = inlined_call_operand.vmem [shape: f32[64,32], index: 11, kind: input, shape index: {}]   ;;  %s2486_s12 = inlined_call_operand.vmem [shape: f32[1,32], index: 12, kind: input, shape index: {}]   ;;  %s2487_s13 = inlined_call_operand.hbm [shape: f32[2,8,32], index: 13, kind: output, shape index: {}]  }
   0x1   :  { %2488 = sst [smem:[#allocation5_spill]] %s2474_s0 }
   0x2   :  { %2489 = sst [smem:[#allocation6_spill]] %s2475_s1 }
   0x3   :  { %2490 = sst [smem:[#allocation7_spill]] %s2476_s2 }
   0x4   :  { %18 = vsyncpa [#allocation3], 0 }
   0x5   :  { %20 = vsyncpa [#allocation3 + $0x1], 0  ;;  %s2212_s25 = smov 0   ;;  %s2214_s26 = smov 0  }
   0x6   :  { %s2216_s27 = smov 0   ;;  %s2218_s28 = smov 0  }
   0x7 LB: > { %s2233_s29 = sadd.s32 4294967295, %s2136_s28   ;;  %s1823_s30 = sadd.s32 4294967294, %s2136_s28   ;;  %s2136_s28 = sphi %s2218_s28, %s2499_s28   ;;  %s2132_s27 = sphi %s2216_s27, %s2498_s27   ;;  %s2128_s26 = sphi %s2214_s26, %s2497_s26   ;;  %s2124_s25 = sphi %s2212_s25, %s2496_s25  }
   0x8   : > { %s2237_s14 = sadd.s32 1, %s2136_s28   ;;  %s331_s15 = sadd.s32 1, %s2132_s27 }
   0x9   : > { %s328_s16 = ssub.s32 %s2136_s28, %s2237_s14  ;;  %p341_p0 = scmp.ne.s32.totalorder %s2132_s27, %s2128_s26 }
   0xa   : > { %p329_p1 = scmp.eq.s32.totalorder %s328_s16, 0  ;;  %p342_p2 = scmp.eq.s32.totalorder %s2233_s29, 1 }
   0xb   : > { %p347_p3 = scmp.ne.s32.totalorder %s2128_s26, %s2124_s25  ;;  %p348_p4 = scmp.eq.s32.totalorder %s1823_s30, 1 }
   0xc   : > { %s2248_s17 = scalar_select %p329_p1, %s2132_s27, %s331_s15  }
   0xd   : > { %p2250_p5 = por %p342_p2, %p341_p0  ;;  %p2254_p6 = por %p348_p4, %p347_p3 }
   0xe   : > { %p1826_p7 = scmp.ge.s32.totalorder %s2136_s28, 1  ;;  %p428_p8 = scmp.lt.s32.totalorder %s2136_s28, 3 }
  0x10   : > { %p429_p9 = pnand %p1826_p7, %p428_p8 }
  0x11   : > { %p490_p10 = scmp.lt.s32.totalorder (!%p429_p9), %s2233_s29, 1  ;;  %v2138_v0 = vmov (!%p429_p9), 0.0   ;;  %vm2139_vm0 = vmmov (!%p429_p9), 0   ;;  %vm526_vm1 = vcmask (!%p429_p9), 64512   ;;  %s2493_s1 = sld [smem:[#allocation6_spill]] (!%p429_p9)  ;;  %v1167_v62 = vld [vmem:[%s2479_s5] sm:$0xff] (!%p429_p9) }
  0x12   : > { %432 = sbr.rel (%p429_p9) target bundleno = 2076 (0x81c), region = 72  ;;  %1904 = vmatprep.subr.mxu0 (!%p429_p9), %v2138_v0  ;;  %1906 = vmatprep.mubr.msk.f32.mxu0 (!%p429_p9), %vm2139_vm0, %v2138_v0  ;;  %s2494_s0 = sld [smem:[#allocation5_spill]] (!%p429_p9)  ;;  %v1168_v63 = vld [vmem:[%s2479_s5 + $0x8] sm:$0xff] (!%p429_p9)  ;;  %vm1463_vm2 = vcmask (!%p429_p9), 261120   ;;  %vm1611_vm3 = vcmask (!%p429_p9), 523264  }
  0x13   : > { %1919 = vmatprep.subr.mxu1 (!%p429_p9), %v2138_v0  ;;  %1921 = vmatprep.mubr.msk.f32.mxu1 (!%p429_p9), %vm2139_vm0, %v2138_v0  ;;  %s2495_s2 = sld [smem:[#allocation7_spill]] (!%p429_p9)  ;;  %s1860_s15 = sshll.u32 (!%p429_p9), %s2233_s29, 7 }
  0x19   : > { %s2265_s20 = scalar_select %p490_p10, %s2233_s29, 1 }
  0x1a   : > { %s2141_s29 = smov [#allocation2]  }
  0x1b   : > { %s2271_s21 = sshll.u32 %s2265_s20, 5  ;;  %s1834_s22 = sshll.u32 %s2265_s20, 3 }
  0x1c   : > { %s499_s24 = scalar_lea.vmem %s2493_s1, %s2271_s21  ;;  %s494_s16 = scalar_lea.vmem %s2494_s0, %s2271_s21 }
  0x1d   : > { %v517_v1 = vld [vmem:[%s499_s24] sm:$0xff]  ;;  %v518_v3 = vld [vmem:[%s499_s24 + $0x8] sm:$0xff]  ;;  %v520_v4 = vld [vmem:[%s499_s24 + $0x18] sm:$0xff]  ;;  %s508_s30 = scalar_lea.vmem %s2477_s3, %s1834_s22  ;;  %s504_s23 = scalar_lea.vmem %s2495_s2, %s2271_s21 }
  0x1e   : > { %1905 = vmatpush3.xpose.msk.msra.mxu0 %vm526_vm1, %v517_v1  ;;  %v513_v2 = vld [vmem:[%s494_s16] sm:$0xff]  ;;  %1920 = vmatpush3.xpose.msk.msra.mxu1 %vm526_vm1, %v520_v4  ;;  %v516_v5 = vld [vmem:[%s494_s16 + $0x18] sm:$0xff]  ;;  %v514_v6 = vld [vmem:[%s494_s16 + $0x8] sm:$0xff] }
  0x1f   : > { %1909 = vmatprep.subr.mxu0 %v2138_v0  ;;  %1929 = vmatprep.subr.mxu1 %v2138_v0  ;;  %v519_v7 = vld [vmem:[%s499_s24 + $0x10] sm:$0xff]  ;;  %v525_v9 = vld [vmem:[%s508_s30] sm:$0xff]  ;;  %v522_v47 = vld [vmem:[%s504_s23 + $0x8] sm:$0xff]  ;;  %s487_s24 = sand.u32 1, %s2128_s26  }
  0x20   : > { %v515_v8 = vld [vmem:[%s494_s16 + $0x10] sm:$0xff]  ;;  %v521_v46 = vld [vmem:[%s504_s23] sm:$0xff]  ;;  %v524_v57 = vld [vmem:[%s504_s23 + $0x18] sm:$0xff]  ;;  %s512_s16 = scalar_lea.vmem %s2478_s4, %s1834_s22  ;;  %s1827_s30 = sshll.u32 %s487_s24, 3 }
  0x21   : > { %1907 = vmatmul.mubr.msk.f32.vlgmr.msra.gmra.mrb[0].mxu0 %vm526_vm1, %v513_v2  ;;  %1922 = vmatmul.mubr.msk.f32.vlgmr.msra.gmra.mrb[0].mxu1 %vm526_vm1, %v516_v5  ;;  %v523_v54 = vld [vmem:[%s504_s23 + $0x10] sm:$0xff]  ;;  %v1170_v4 = vld [vmem:[%s2479_s5 + $0x18] sm:$0xff]  ;;  %s2431_s22 = scalar_lea.hbm %s2487_s13, %s1860_s15  ;;  %s1703_s0 = scalar_lea.sflag [#allocation3], %s487_s24 }
  0x22   : > { %1910 = vmatpush3.xpose.msk.msra.mxu0 %vm526_vm1, %v518_v3  ;;  %1911 = vmatprep.mubr.msk.f32.mxu0 %vm2139_vm0, %v2138_v0  ;;  %v1169_v1 = vld [vmem:[%s2479_s5 + $0x10] sm:$0xff] }
  0x23   : > { %1914 = vmatprep.subr.mxu0 %v2138_v0  ;;  %1931 = vmatprep.mubr.msk.f32.mxu1 %vm2139_vm0, %v2138_v0 }
  0x24   : > { %1930 = vmatpush3.msra.mxu1 %v522_v47 }
  0x25   : > { %1912 = vmatmul.mubr.msk.f32.vlgmr.msra.gmra.mrb[2].mxu0 %vm526_vm1, %v514_v6  ;;  %1939 = vmatprep.subr.mxu1 %v2138_v0 }
  0x26   : > { %1915 = vmatpush3.xpose.msk.msra.mxu0 %vm526_vm1, %v519_v7  ;;  %1916 = vmatprep.mubr.msk.f32.mxu0 %vm2139_vm0, %v2138_v0 }
  0x27   : > { %1924 = vmatprep.subr.mxu0 %v2138_v0 }
  0x29   : > { %1917 = vmatmul.mubr.msk.f32.vlgmr.msra.gmra.mrb[4].mxu0 %vm526_vm1, %v515_v8 }
  0x2a   : > { %1926 = vmatprep.mubr.msk.f32.mxu0 %vm2139_vm0, %v2138_v0  ;;  %1925 = vmatpush3.msra.mxu0 %v521_v46  ;;  %v1599_v46 = vld [vmem:[%s2485_s11 + $0x18] sm:$0xff] }
  0x2b   : > { %1934 = vmatprep.subr.mxu0 %v2138_v0 }
  0xf4   : > { %v599_v10 = vpop.f32.mrb[0].mxu0  ;;  %v827_v13 = vpop.f32.mrb[0].mxu1 }
  0xf5   : > { %v600_v11 = vadd.f32 %v599_v10, %v525_v9  ;;  %v1908_v12 = vpop.f32.mrb[1].mxu0  ;;  %v1923_v15 = vpop.f32.mrb[1].mxu1  ;;  %v828_v23 = vadd.f32 %v827_v13, %v525_v9 }
  0xf7   : > { %v831_v14 = vsel %vm526_vm1, %v600_v11, -inf  ;;  %v840_v25 = vsel %vm526_vm1, %v828_v23, -inf }
  0xf8   : > { %832 = vmax.xlane.f32.xlu0 %v831_v14  ;;  %v675_v16 = vpop.f32.mrb[2].mxu0 }
  0xf9   : > { %v676_v17 = vadd.f32 %v675_v16, %v525_v9  ;;  %v1913_v18 = vpop.f32.mrb[3].mxu0 }
  0xfb   : > { %v834_v19 = vsel %vm526_vm1, %v676_v17, -inf }
  0xfc   : > { %835 = vmax.xlane.f32.xlu0 %v834_v19  ;;  %v751_v20 = vpop.f32.mrb[4].mxu0 }
  0xfd   : > { %v752_v21 = vadd.f32 %v751_v20, %v525_v9  ;;  %v1918_v22 = vpop.f32.mrb[5].mxu0 }
  0xff   : > { %v837_v24 = vsel %vm526_vm1, %v752_v21, -inf }
 0x100   : > { %838 = vmax.xlane.f32.xlu1 %v837_v24 }
 0x104   : > { %841 = vmax.xlane.f32.xlu1 %v840_v25 }
 0x185   : > { %v833_v26 = vpop.xlane.xlu0 %832 }
 0x186   : > { %v843_v27 = vsub.f32 %v600_v11, %v833_v26  ;;  %v1479_v26 = vld [vmem:[%s512_s16] sm:$0xff]  ;;  %s489_s16 = scalar_lea.vmem [#allocation2], %s1827_s30  ;;  %s2078_s30 = sshll.u32 %s2141_s29, 4  ;;  %s2079_s30 = int_to_ptr.vmem [resolvable:$false] %s2078_s30 }
 0x187   : > { %s1716_s23 = sshll.u32 %s489_s16, 4  ;;  %s2080_s2 = scalar_lea.vmem %s2079_s30, 256  ;;  %s2433_s23 = int_to_ptr.vmem [resolvable:$true] %s1716_s23 }
 0x188   : > { %v847_v28 = vmul.f32 1.442695, %v843_v27  ;;  %s2074_s1 = scalar_lea.vmem %s2433_s23, 128  ;;  %p2081_p0 = scmp.lt.s32.totalorder %s2433_s23, %s2079_s30 }
 0x189   : > { %v836_v29 = vpop.xlane.xlu0 %835  ;;  %p2075_p11 = scmp.ne.s32.totalorder %s2433_s23, %s2074_s1  ;;  %p2082_p1 = scmp.lt.s32.totalorder %s2080_s2, %s2074_s1 }
 0x18a   : > { %2054 = vpow2.f32 %v847_v28  ;;  %v844_v30 = vsub.f32 %v676_v17, %v836_v29 }
 0x18b   : > { %p2076_p12 = pnand %p2075_p11, %p2250_p5  ;;  %p2083_p2 = por %p2082_p1, %p2081_p0 }
 0x18c   : > { %v849_v31 = vmul.f32 1.442695, %v844_v30 }
 0x18d   : > { %v839_v32 = vpop.xlane.xlu1 %838  ;;  %p2077_p13 = pneg %p2076_p12 }
 0x18e   : > { %2056 = vpow2.f32 %v849_v31  ;;  %v845_v33 = vsub.f32 %v752_v21, %v839_v32 }
 0x18f   : > { %p2084_p3 = pnand %p2083_p2, %p2077_p13 }
 0x190   : > { %v851_v34 = vmul.f32 1.442695, %v845_v33 }
 0x191   : > { %v842_v35 = vpop.xlane.xlu1 %841 }
 0x192   : > { %2058 = vpow2.f32 %v851_v34  ;;  %v846_v36 = vsub.f32 %v828_v23, %v842_v35  ;;  %v1852_v23 = vld [vmem:[%s2480_s6] ss:$0 sm:$0xff] }
 0x193   : > { %v1511_v35 = vld [vmem:[%s2483_s9] sm:$0xff] }
 0x194   : > { %v2055_v37 = vpop.eup %2054  ;;  %v853_v38 = vmul.f32 1.442695, %v846_v36  ;;  %v1512_v36 = vld [vmem:[%s2483_s9 + $0x8] sm:$0xff] }
 0x195   : > { %v855_v39 = vsel %vm526_vm1, %v2055_v37, 0.0 }
 0x196   : > { %2060 = vpow2.f32 %v853_v38  ;;  %856 = vadd.xlane.f32.xlu0 %v855_v39  ;;  %v2140_v38 = vmov 0.0|0.0   ;;  %v1513_v39 = vld [vmem:[%s2483_s9 + $0x10] sm:$0xff] }
 0x198   : > { %v2057_v40 = vpop.eup %2056 }
 0x199   : > { %v858_v41 = vsel %vm526_vm1, %v2057_v40, 0.0 }
 0x19a   : > { %859 = vadd.xlane.f32.xlu1 %v858_v41 }
 0x19c   : > { %v2059_v42 = vpop.eup %2058 }
 0x19d   : > { %v861_v43 = vsel %vm526_vm1, %v2059_v42, 0.0 }
 0x19e   : > { %862 = vadd.xlane.f32.xlu0 %v861_v43  ;;  %v1597_v43 = vld [vmem:[%s2485_s11 + $0x8] sm:$0xff] }
 0x1a0   : > { %v2061_v44 = vpop.eup %2060 }
 0x1a1   : > { %v864_v45 = vsel %vm526_vm1, %v2061_v44, 0.0 }
 0x1a2   : > { %865 = vadd.xlane.f32.xlu1 %v864_v45 }
 0x223   : > { %v857_v48 = vpop.xlane.xlu0 %856 }
 0x224   : > { %2062 = vrcp.f32 %v857_v48  ;;  %v1600_v48 = vld [vmem:[%s2485_s11 + $0x20] sm:$0xff] }
 0x227   : > { %v860_v49 = vpop.xlane.xlu1 %859 }
 0x228   : > { %2064 = vrcp.f32 %v860_v49  ;;  %v1601_v49 = vld [vmem:[%s2485_s11 + $0x28] sm:$0xff] }
 0x22b   : > { %v863_v50 = vpop.xlane.xlu0 %862 }
 0x22c   : > { %2066 = vrcp.f32 %v863_v50  ;;  %v2007_v50 = vpack.c.bf16 %v1601_v49, %v1600_v48 }
 0x22e   : > { %v2063_v51 = vpop.eup %2062 }
 0x22f   : > { %v868_v52 = vmul.f32 %v2063_v51, %v2055_v37  ;;  %v866_v53 = vpop.xlane.xlu1 %865  ;;  %v1995_v37 = vpack.c.bf16 %v1512_v36, %v1511_v35 }
 0x230   : > { %2068 = vrcp.f32 %v866_v53 }
 0x231   : > { %1927 = vmatmul.mubr.msk.f32.vlgmr.msra.gmra.mrb[6].mxu0 %vm526_vm1, %v868_v52 }
 0x232   : > { %v2065_v55 = vpop.eup %2064  ;;  %1935 = vmatpush3.msra.mxu0 %v523_v54  ;;  %1936 = vmatprep.mubr.msk.f32.mxu0 %vm2139_vm0, %v2138_v0 }
 0x233   : > { %v870_v56 = vmul.f32 %v2065_v55, %v2057_v40  ;;  %1944 = vmatprep.subr.mxu0 %v2138_v0  ;;  %v1514_v40 = vld [vmem:[%s2483_s9 + $0x18] sm:$0xff]  ;;  %v1853_v55 = vld [vmem:[%s2481_s7] ss:$0 sm:$0xff] }
 0x234   : > { %v1998_v41 = vpack.c.bf16 %v1514_v40, %v1513_v39 }
 0x235   : > { %1932 = vmatmul.mubr.msk.f32.vlgmr.msra.gmra.mrb[2].mxu1 %vm526_vm1, %v870_v56 }
 0x236   : > { %v2067_v58 = vpop.eup %2066  ;;  %1940 = vmatpush3.msra.mxu1 %v524_v57  ;;  %1941 = vmatprep.mubr.msk.f32.mxu1 %vm2139_vm0, %v2138_v0  ;;  %v1854_v57 = vld [vmem:[%s2482_s8] ss:$0 sm:$0xff] }
 0x237   : > { %v872_v59 = vmul.f32 %v2067_v58, %v2059_v42  ;;  %1949 = vmatprep.subr.mxu1 %v2138_v0  ;;  %v1596_v42 = vld [vmem:[%s2485_s11] sm:$0xff] }
 0x238   : > { %v2001_v45 = vpack.c.bf16 %v1597_v43, %v1596_v42 }
 0x239   : > { %1937 = vmatmul.mubr.msk.f32.vlgmr.msra.gmra.mrb[8].mxu0 %vm526_vm1, %v872_v59 }
 0x23a   : > { %v2069_v60 = vpop.eup %2068  ;;  %1946 = vmatprep.mubr.msk.f32.mxu0 %vm2139_vm0, %v2138_v0  ;;  %1945 = vmatpush3.msra.mxu0 %v1167_v62 }
 0x23b   : > { %v874_v61 = vmul.f32 %v2069_v60, %v2061_v44  ;;  %1954 = vmatprep.subr.mxu0 %v2138_v0  ;;  %v1598_v44 = vld [vmem:[%s2485_s11 + $0x10] sm:$0xff] }
 0x23c   : > { %v2004_v47 = vpack.c.bf16 %v1599_v46, %v1598_v44  ;;  %v1602_v60 = vld [vmem:[%s2485_s11 + $0x30] sm:$0xff] }
 0x23d   : > { %1942 = vmatmul.mubr.msk.f32.vlgmr.msra.gmra.mrb[4].mxu1 %vm526_vm1, %v874_v61  ;;  %v1603_v61 = vld [vmem:[%s2485_s11 + $0x38] sm:$0xff] }
 0x23e   : > { %1951 = vmatprep.mubr.msk.f32.mxu1 %vm2139_vm0, %v2138_v0  ;;  %1950 = vmatpush3.msra.mxu1 %v1168_v63  ;;  %v2010_v62 = vpack.c.bf16 %v1603_v61, %v1602_v60  ;;  %v1855_v63 = vld [vmem:[%s2484_s10] ss:$0 sm:$0xff] }
 0x23f   : > { %1959 = vmatprep.subr.mxu1 %v2138_v0 }
 0x304   : > { %v944_v2 = vpop.f32.mrb[6].mxu0 }
 0x305   : > { %v1928_v3 = vpop.f32.mrb[7].mxu0  ;;  %1947 = vmatmul.mubr.msk.f32.vlgmr.msra.gmra.mrb[10].mxu0 %vm526_vm1, %v944_v2 }
 0x306   : > { %1955 = vmatpush3.msra.mxu0 %v1169_v1  ;;  %1956 = vmatprep.mubr.msk.f32.mxu0 %vm2139_vm0, %v2138_v0 }
 0x307   : > { %1994 = vmatprep.subr.bf16.mxu0 %v2140_v38 }
 0x308   : > { %v1017_v5 = vpop.f32.mrb[2].mxu1 }
 0x309   : > { %v1933_v6 = vpop.f32.mrb[3].mxu1  ;;  %1952 = vmatmul.mubr.msk.f32.vlgmr.msra.gmra.mrb[6].mxu1 %vm526_vm1, %v1017_v5  ;;  %v1857_v5 = vld [vmem:[%s2486_s12] ss:$0 sm:$0xff] }
 0x30a   : > { %1960 = vmatpush3.msra.mxu1 %v1170_v4  ;;  %1961 = vmatprep.mubr.msk.f32.mxu1 %vm2139_vm0, %v2138_v0 }
 0x30b   : > { %2000 = vmatprep.subr.bf16.mxu1 %v2140_v38 }
 0x30c   : > { %v1090_v7 = vpop.f32.mrb[8].mxu0 }
 0x30d   : > { %v1938_v8 = vpop.f32.mrb[9].mxu0  ;;  %1957 = vmatmul.mubr.msk.f32.vlgmr.msra.gmra.mrb[12].mxu0 %vm526_vm1, %v1090_v7 }
 0x30e   : > { %1972 = vmatprep.mubr.msk.f32.mxu0 %vm2139_vm0, %v2138_v0  ;;  %1996 = vmatpush3.bf16.msra.mxu0 %v1995_v37 }
 0x30f   : > { %1997 = vmatprep.subr.bf16.mxu0 %v2140_v38 }
 0x310   : > { %v1163_v9 = vpop.f32.mrb[4].mxu1 }
 0x311   : > { %v1943_v10 = vpop.f32.mrb[5].mxu1  ;;  %1962 = vmatmul.mubr.msk.f32.vlgmr.msra.gmra.mrb[8].mxu1 %vm526_vm1, %v1163_v9 }
 0x312   : > { %1991 = vmatprep.mubr.msk.f32.mxu1 %vm2139_vm0, %v2138_v0  ;;  %1999 = vmatpush3.bf16.msra.mxu0 %v1998_v41 }
 0x313   : > { %2002 = vmatpush3.bf16.msra.mxu1 %v2001_v45 }
 0x314   : > { %2003 = vmatprep.subr.bf16.mxu1 %v2140_v38 }
 0x317   : > { %2005 = vmatpush3.bf16.msra.mxu1 %v2004_v47 }
 0x318   : > { %2006 = vmatprep.subr.bf16.mxu1 %v2140_v38 }
 0x31b   : > { %2008 = vmatpush3.bf16.msra.mxu1 %v2007_v50 }
 0x31c   : > { %2009 = vmatprep.subr.bf16.mxu1 %v2140_v38 }
 0x31f   : > { %2011 = vmatpush3.bf16.msra.mxu1 %v2010_v62 }
 0x3d8   : > { %v1240_v11 = vpop.f32.mrb[10].mxu0 }
 0x3d9   : > { %v1948_v12 = vpop.f32.mrb[11].mxu0  ;;  %v1464_v14 = vsel %vm1463_vm2, %v1240_v11, 0.0 }
 0x3dc   : > { %v1313_v13 = vpop.f32.mrb[6].mxu1 }
 0x3dd   : > { %v1465_v15 = vsel %vm1463_vm2, %v1313_v13, 0.0  ;;  %v1953_v16 = vpop.f32.mrb[7].mxu1 }
 0x3de   : > { %v1466_v17 = vadd.f32 %v1465_v15, %v1464_v14 }
 0x3e0   : > { %v1386_v18 = vpop.f32.mrb[12].mxu0 }
 0x3e1   : > { %v1467_v19 = vsel %vm1463_vm2, %v1386_v18, 0.0  ;;  %v1958_v20 = vpop.f32.mrb[13].mxu0 }
 0x3e2   : > { %v1468_v21 = vadd.f32 %v1467_v19, %v1466_v17 }
 0x3e4   : > { %v1459_v22 = vpop.f32.mrb[8].mxu1 }
 0x3e5   : > { %v1469_v0 = vsel %vm1463_vm2, %v1459_v22, 0.0  ;;  %v1963_v24 = vpop.f32.mrb[9].mxu1 }
 0x3e6   : > { %v1470_v25 = vadd.f32 %v1469_v0, %v1468_v21 }
 0x3e8   : > { %v1478_v27 = vadd.f32 %v1852_v23, %v1470_v25 }
 0x3ea   : > { %v1482_v28 = vadd.f32 %v1479_v26, %v1478_v27 }
 0x3ec   : > { %v1483_v29 = vsel %vm1463_vm2, %v1482_v28, 0.0 }
 0x3ed   : > { %1484 = vadd.xlane.f32.xlu0 %v1483_v29 }
 0x47a   : > { %v1485_v30 = vpop.xlane.xlu0 %1484 }
 0x47b   : > { %v1487_v31 = vmul.f32 0.03125, %v1485_v30 }
 0x47d   : > { %v1488_v32 = vsub.f32 %v1482_v28, %v1487_v31 }
 0x47f   : > { %v1489_v33 = vmul.f32 %v1488_v32, %v1488_v32 }
 0x481   : > { %v1490_v34 = vsel %vm1463_vm2, %v1489_v33, 0.0 }
 0x482   : > { %1491 = vadd.xlane.f32.xlu1 %v1490_v34 }
 0x50f   : > { %v1492_v51 = vpop.xlane.xlu1 %1491 }
 0x510   : > { %v1493_v52 = vmul.f32 0.03125, %v1492_v51 }
 0x512   : > { %v1494_v53 = vadd.f32 1e-05, %v1493_v52 }
 0x514   : > { %2070 = vrsqrt.f32 %v1494_v53 }
 0x51e   : > { %v2071_v54 = vpop.eup %2070 }
 0x51f   : > { %v1496_v56 = vmul.f32 %v2071_v54, %v1488_v32 }
 0x521   : > { %v1503_v58 = vmul.f32 %v1853_v55, %v1496_v56 }
 0x523   : > { %v1510_v59 = vadd.f32 %v1854_v57, %v1503_v58 }
 0x525   : > { %1973 = vmatmul.mubr.msk.f32.vlgmr.msra.gmra.mrb[14].mxu0 %vm1463_vm2, %v1510_v59 }
 0x5f8   : > { %v1591_v1 = vpop.f32.mrb[14].mxu0 }
 0x5f9   : > { %v1592_v2 = vadd.f32 %v1855_v63, %v1591_v1  ;;  %v1974_v3 = vpop.f32.mrb[15].mxu0 }
 0x5fb   : > { %v1595_v4 = vmax.f32 %v1592_v2, 0.0 }
 0x5fd   : > { %1992 = vmatmul.mubr.msk.f32.vlgmr.msra.gmra.mrb[10].mxu1 %vm1611_vm3, %v1595_v4 }
 0x6d0   : > { %v1681_v6 = vpop.f32.mrb[10].mxu1 }
 0x6d1   : > { %v1682_v7 = vadd.f32 %v1857_v5, %v1681_v6  ;;  %v1993_v8 = vpop.f32.mrb[11].mxu1 }
 0x6d3   : > { %v1685_v9 = vadd.f32 %v1682_v7, %v1510_v59 }
 0x6d5   : > { %v1686_v10 = vsel %vm1463_vm2, %v1685_v9, 0.0 }
 0x6d6   : > { %1687 = vadd.xlane.f32.xlu0 %v1686_v10 }
 0x763   : > { %v1688_v11 = vpop.xlane.xlu0 %1687 }
 0x764   : > { %v1689_v12 = vmul.f32 0.03125, %v1688_v11 }
 0x766   : > { %v1690_v13 = vsub.f32 %v1685_v9, %v1689_v12 }
 0x768   : > { %v1691_v14 = vmul.f32 %v1690_v13, %v1690_v13 }
 0x76a   : > { %v1692_v15 = vsel %vm1463_vm2, %v1691_v14, 0.0 }
 0x76b   : > { %1693 = vadd.xlane.f32.xlu1 %v1692_v15 }
 0x7f8   : > { %v1694_v16 = vpop.xlane.xlu1 %1693 }
 0x7f9   : > { %v1695_v17 = vmul.f32 0.03125, %v1694_v16 }
 0x7fb   : > { %v1696_v18 = vadd.f32 1e-05, %v1695_v17 }
 0x7fd   : > { %2072 = vrsqrt.f32 %v1696_v18 }
 0x807   : > { %v2073_v19 = vpop.eup %2072 }
 0x808   : > { %v1698_v20 = vmul.f32 %v2073_v19, %v1690_v13 }
 0x80a   : > { %v1699_v21 = vmul.f32 %v1853_v55, %v1698_v20 }
 0x80c   : > { %v1700_v22 = vadd.f32 %v1854_v57, %v1699_v21 }
 0x80e   : > { %1701 = vst.msk [vmem:[%s489_s16] sm:$0xff] %vm1463_vm2, %v1700_v22 }
 0x80f   : > { %2087 = shalt.err (!%p2084_p3)
}
 0x810   : > { %s2088_s24 = scalar_lea.hbm %s2431_s22, 128  ;;  %s2092_s21 = scalar_lea.hbm %s2487_s13, 256 }
 0x811   : > { %p2089_p4 = scmp.ne.s32.totalorder %s2431_s22, %s2088_s24  ;;  %p2093_p9 = scmp.lt.u32.totalorder %s2431_s22, %s2487_s13 }
 0x812   : > { %p2094_p10 = scmp.lt.u32.totalorder %s2092_s21, %s2088_s24  ;;  %p2096_p12 = scmp.lt.u32.totalorder %s2088_s24, %s2431_s22 }
 0x813   : > { %p2090_p7 = pnand %p2089_p4, %p2250_p5 }
 0x814   : > { %p2095_p11 = por %p2094_p10, %p2093_p9 }
 0x815   : > { %p2091_p8 = pneg %p2090_p7 }
 0x816   : > { %p2097_p13 = por %p2096_p12, %p2095_p11 }
 0x818   : > { %p2098_p0 = pnand %p2097_p13, %p2091_p8 }
 0x81a   : > { %2101 = shalt.err (!%p2098_p0)
}
 0x81b   : > { %2012 = dma.vmem_to_hbm [thread:$0]  (%p2250_p5), %s2433_s23, 128, %s2431_s22, %s1703_s0  }
 0x81c PF: > { %p2018_p1 = scmp.ge.s32.totalorder %s2136_s28, 2  ;;  %s1728_s2 = sand.u32 1, %s2124_s25  }
 0x81d   : > { %s1729_s1 = scalar_lea.sflag [#allocation3], %s1728_s2 }
 0x81e   : > { %p2015_p2 = pnand %p2018_p1, %p2254_p6 }
 0x820   : > { %2119 = dma.done.wait (!%p2015_p2), %s1729_s1, 128  }
 0x821   : > { %2121 = vsyncadd (!%p2015_p2), %s1729_s1, 4294967168  ;;  %p23_p3 = scmp.ge.s32.totalorder %s2237_s14, 4   ;;  %s2496_s25 = smov %s2128_s26 }
 0x822   : > { %s2497_s26 = smov %s2132_s27  ;;  %s2498_s27 = smov %s2248_s17 }
 0x823   : > { %s2499_s28 = smov %s2237_s14  ;;  %25 = sbr.rel (!%p23_p3) target bundleno = 7 (0x7), region = 119 }
 0x82a   :  { %1734 = vsyncpa [#allocation3], 1 }
 0x82b   :  { %1736 = vsyncpa [#allocation3 + $0x1], 1 }

</bundles_post_ra>
